<compile_context>
chip_gen: v7x
topology: tpu7x:2x2x1
jax: 0.10.0
libtpu: 0.0.40
codegen_flags: <defaults>
</compile_context>

<pallas_src>
import jax
import jax.numpy as jnp
from jax.experimental import pallas as pl
from jax.experimental.pallas import tpu as pltpu


def _round_up(n: int, m: int) -> int:
    return ((n + m - 1) // m) * m


def _linear_kernel(x_ref, w_ref, b_ref, o_ref):
    # x_ref : (tbp, pack*D)  f32 VMEM  -- lane-packed batch tile (pack logical rows per packed row)
    # w_ref : (pack*D, pack) f32 VMEM  -- block-diagonal replicated weight, resident across grid
    # b_ref : (1,)           f32 SMEM  -- scalar bias
    # o_ref : (tbp, pack)    f32 VMEM  -- packed logits; row-major flatten == (tbp*pack, 1)
    o_ref[...] = (
        jnp.dot(x_ref[...], w_ref[...], preferred_element_type=jnp.float32)
        + b_ref[0]
    )


def logistic_regression_forward(
    x,
    weight,
    bias,
    *,
    block_rows: int = 32768,
    min_rows_for_pallas: int = 4096,
    force_pallas: bool = False,
):
    """Logits of torch.nn.Linear(D, 1): x:(B, D), weight:(1, D), bias:(1,) -> (B, 1)."""
    x = jnp.asarray(x, jnp.float32)
    weight = jnp.asarray(weight, jnp.float32).reshape(1, -1)
    bias = jnp.asarray(bias, jnp.float32).reshape(1)

    B, D = x.shape

    # Small-batch bypass: below the threshold, one grid step's DMA/launch overhead
    # dominates and the custom-call boundary would block XLA fusion.
    if (not force_pallas) and B < min_rows_for_pallas:
        return x @ weight.T + bias[None, :]

    # Lane-pack the small feature dim into full 128-lane vregs:
    # (B, D) -> (B/pack, pack*D), a contiguous row-major reinterpretation.
    pack = 128 // D if (D <= 128 and 128 % D == 0) else 1

    # Pad only to the pack granularity (<= pack-1 rows), never to a tile multiple:
    # Pallas masks the ragged last block itself, avoiding a full HBM copy of x.
    b_pad = _round_up(B, pack)
    if b_pad != B:
        x = jnp.pad(x, ((0, b_pad - B), (0, 0)))
    bp = b_pad // pack                       # packed row count
    x_packed = x.reshape(bp, pack * D)

    # Block-replicated weight: wmat[j*D + k, j] = w[k]  (shape (pack*D, pack)),
    # so (x_packed @ wmat)[r, j] == dot(x[r*pack + j], w).  The per-row reduction
    # runs on the otherwise-idle MXU instead of VPU multiply + XLU lane reduce.
    w = weight.reshape(D)
    eye = jnp.eye(pack, dtype=jnp.float32)
    wmat = (eye[:, None, :] * w[None, :, None]).reshape(pack * D, pack)

    # Batch tiling (in packed rows): multiple of 8 sublanes, multi-MB x tiles to
    # amortize per-grid-step overhead, while 2x(in) + 2x(out) double buffers stay
    # inside a 32 MiB scoped-VMEM budget (safe on v5e/v6e and v7x's 64 MiB VMEM).
    tbp = max(8, _round_up(block_rows // pack, 8))
    tbp = min(tbp, _round_up(bp, 8))
    grid = (pl.cdiv(bp, tbp),)

    out_packed = pl.pallas_call(
        _linear_kernel,
        out_shape=jax.ShapeDtypeStruct((bp, pack), jnp.float32),
        grid_spec=pltpu.PrefetchScalarGridSpec(
            num_scalar_prefetch=0,
            grid=grid,
            in_specs=[
                # x: pipelined, fully lane-dense batch tiles (double-buffered HBM->VMEM DMA).
                pl.BlockSpec((tbp, pack * D), lambda i: (i, 0)),
                # replicated weight: constant block index -> fetched once, stays VMEM-resident.
                pl.BlockSpec((pack * D, pack), lambda i: (0, 0)),
                # bias: 4-byte scalar in SMEM, no VMEM tile / DMA needed.
                pl.BlockSpec(memory_space=pltpu.MemorySpace.SMEM),
            ],
            # (tbp, pack) output is pack-x lane-denser than (tb, 1); the row-major
            # flatten back to (B, 1) is free in the wrapper.
            out_specs=pl.BlockSpec((tbp, pack), lambda i: (i, 0)),
        ),
        compiler_params=pltpu.CompilerParams(
            dimension_semantics=("parallel",),      # megacore sharding of batch tiles
            vmem_limit_bytes=32 * 1024 * 1024,
        ),
    )(x_packed, wmat, bias)

    # (bp, pack) row-major == (b_pad, 1); the <= pack-1 pad rows and any garbage in
    # a ragged last block fall outside [:B].
    return out_packed.reshape(b_pad, 1)[:B]


if __name__ == "__main__":
    key = jax.random.PRNGKey(0)
    kx, kw, kb = jax.random.split(key, 3)

    # Shapes consistent with the module: batch = train_subset_size = 20, input_dim = 32.
    batch = 20
    input_dim = 32

    x = jax.random.normal(kx, (batch, input_dim), dtype=jnp.float32)
    # Deterministic synthetic parameters (stand-ins for sklearn coef_ / intercept_).
    weight = jax.random.normal(kw, (1, input_dim), dtype=jnp.float32) * 0.1
    bias = jax.random.normal(kb, (1,), dtype=jnp.float32) * 0.1

    ref = x @ weight.T + bias[None, :]

    # 1) Production shape through the auto path (small-batch XLA bypass).
    out_bypass = jax.block_until_ready(logistic_regression_forward(x, weight, bias))
    assert out_bypass.shape == (batch, 1)
    assert jnp.allclose(out_bypass, ref, atol=1e-5, rtol=1e-5)

    # 2) Same shape forced through the Pallas kernel (single ragged tile).
    out_small = jax.block_until_ready(
        logistic_regression_forward(x, weight, bias, force_pallas=True)
    )
    assert out_small.shape == (batch, 1)
    assert jnp.allclose(out_small, ref, atol=1e-5, rtol=1e-5)

    # 3) Multi-tile path: several grid steps, a ragged last block, and a
    #    non-multiple-of-4 batch (exercises pack padding + out[:B] slice).
    kx2 = jax.random.fold_in(kx, 1)
    batch_big = 2503
    x_big = jax.random.normal(kx2, (batch_big, input_dim), dtype=jnp.float32)
    out_big = jax.block_until_ready(
        logistic_regression_forward(
            x_big, weight, bias, force_pallas=True, block_rows=512
        )
    )
    ref_big = x_big @ weight.T + bias[None, :]
    assert out_big.shape == (batch_big, 1)
    assert jnp.allclose(out_big, ref_big, atol=1e-4, rtol=1e-4)

    print("KERNEL_OK")
</pallas_src>

<mosaic_0001>
module attributes {stable_mosaic.version = 11 : i64} {
  func.func @_linear_kernel(%arg0: i32, %arg1: memref<8x128xf32, #tpu.memory_space<vmem>>, %arg2: memref<128x4xf32, #tpu.memory_space<vmem>>, %arg3: memref<1xf32, #tpu.memory_space<smem>>, %arg4: memref<8x4xf32, #tpu.memory_space<vmem>>) attributes {dimension_semantics = [#tpu.dimension_semantics<parallel>], iteration_bounds = array<i64: 1>, scalar_prefetch = 0 : i64, scratch_operands = 0 : i64, tpu.core_type = #tpu.core_type<tc>, window_params = [{transform_indices = @transform_0, window_bounds = array<i64: 8, 128>}, {pipeline_mode = #tpu.pipeline_mode<synchronous>, transform_indices = @transform_1, window_bounds = array<i64: 128, 4>}, {transform_indices = @transform_2, window_bounds = array<i64: 1>}, {transform_indices = @transform_3, window_bounds = array<i64: 8, 4>}]} {
    %c0 = arith.constant 0 : index
    %c0_0 = arith.constant 0 : index
    %0 = vector.load %arg1[%c0, %c0_0] : memref<8x128xf32, #tpu.memory_space<vmem>>, vector<8x128xf32>
    %c0_1 = arith.constant 0 : index
    %c0_2 = arith.constant 0 : index
    %1 = vector.load %arg2[%c0_1, %c0_2] : memref<128x4xf32, #tpu.memory_space<vmem>>, vector<128x4xf32>
    %cst = arith.constant dense<0.000000e+00> : vector<8x4xf32>
    %2 = tpu.matmul %0, %1, %cst {dimension_numbers = #tpu.dot_dimension_numbers<[1], [0], [0], [1], [0, 0, 1, 1], [], []>} : vector<8x128xf32>, vector<128x4xf32>, vector<8x4xf32> -> vector<8x4xf32>
    %c0_3 = arith.constant 0 : index
    %3 = memref.load %arg3[%c0_3] : memref<1xf32, #tpu.memory_space<smem>>
    %4 = vector.broadcast %3 : f32 to vector<8x4xf32>
    %5 = arith.addf %2, %4 : vector<8x4xf32>
    %c0_4 = arith.constant 0 : index
    %c0_5 = arith.constant 0 : index
    %6 = vector.load %arg4[%c0_4, %c0_5] : memref<8x4xf32, #tpu.memory_space<vmem>>, vector<8x4xf32>
    tpu.vector_store %arg4[%c0_4, %c0_5], %5 {strides = array<i32>} : memref<8x4xf32, #tpu.memory_space<vmem>>, vector<8x4xf32>,
    return
  }
  func.func @transform_0(%arg0: i32) -> (i32, i32) {
    %c0_i32 = arith.constant 0 : i32
    %c0_i32_0 = arith.constant 0 : i32
    return %arg0, %c0_i32 : i32, i32
  }
  func.func @transform_1(%arg0: i32) -> (i32, i32) {
    %c0_i32 = arith.constant 0 : i32
    %c0_i32_0 = arith.constant 0 : i32
    %c0_i32_1 = arith.constant 0 : i32
    return %c0_i32, %c0_i32_0 : i32, i32
  }
  func.func @transform_2(%arg0: i32) -> i32 {
    %c0_i32 = arith.constant 0 : i32
    %c0_i32_0 = arith.constant 0 : i32
    return %c0_i32 : i32
  }
  func.func @transform_3(%arg0: i32) -> (i32, i32) {
    %c0_i32 = arith.constant 0 : i32
    %c0_i32_0 = arith.constant 0 : i32
    return %arg0, %c0_i32 : i32, i32
  }
}

</mosaic_0001>

<bundles_post_ra>
// kernel: tpu_custom_call.1
= control target key start
LH: loop header
LB: loop body
LE: loop exit
PB: predicated region body
PF: predicated region fallthrough
CT: control target
= control target key end

     0   :  { %v189_v0 = vmov 0.0|0.0   ;;  %vm190_vm0 = vmmov 0   ;;  %v191_v4 = vmov 0.0   ;;  %vm104_vm1 = vcmask 31744   ;;  %s269_s1 = inlined_call_operand.vmem [shape: f32[128,4], index: 1, kind: input, shape index: {}]   ;;  %s270_s0 = inlined_call_operand.vmem [shape: f32[5,128], index: 0, kind: input, shape index: {}]   ;;  %s271_s2 = inlined_call_operand.<no memory space> [shape: f32[1], index: 2, kind: input, shape index: {}]   ;;  %s272_s3 = inlined_call_operand.vmem [shape: f32[5,4], index: 3, kind: output, shape index: {}]  }
   0x1   :  { %162 = vmatprep.subr.bf16.mxu0 %v189_v0  ;;  %v16_v1 = vld [vmem:[%s269_s1] sm:$0xff]  ;;  %v17_v2 = vld [vmem:[%s269_s1 + $0x8] sm:$0xff]  ;;  %v18_v3 = vld [vmem:[%s269_s1 + $0x10] sm:$0xff]  ;;  %159 = vmatprep.mubr.msk.f32.mxu0 %vm190_vm0, %v191_v4  ;;  %v33_v27 = vstv %s271_s2 }
   0x2   :  { %v163_v5 = vpack.c.bf16 %v17_v2, %v16_v1  ;;  %v19_v6 = vld [vmem:[%s269_s1 + $0x18] sm:$0xff]  ;;  %v20_v8 = vld [vmem:[%s269_s1 + $0x20] sm:$0xff]  ;;  %v21_v9 = vld [vmem:[%s269_s1 + $0x28] sm:$0xff] }
   0x3   :  { %v166_v7 = vpack.c.bf16 %v19_v6, %v18_v3  ;;  %v169_v10 = vpack.c.bf16 %v21_v9, %v20_v8  ;;  %v22_v11 = vld [vmem:[%s269_s1 + $0x30] sm:$0xff]  ;;  %v23_v12 = vld [vmem:[%s269_s1 + $0x38] sm:$0xff]  ;;  %v24_v14 = vld [vmem:[%s269_s1 + $0x40] sm:$0xff] }
   0x4   :  { %164 = vmatpush3.bf16.msra.mxu0 %v163_v5  ;;  %v172_v13 = vpack.c.bf16 %v23_v12, %v22_v11  ;;  %v25_v15 = vld [vmem:[%s269_s1 + $0x48] sm:$0xff]  ;;  %v26_v17 = vld [vmem:[%s269_s1 + $0x50] sm:$0xff]  ;;  %v27_v18 = vld [vmem:[%s269_s1 + $0x58] sm:$0xff] }
   0x5   :  { %165 = vmatprep.subr.bf16.mxu0 %v189_v0  ;;  %v175_v16 = vpack.c.bf16 %v25_v15, %v24_v14  ;;  %v178_v19 = vpack.c.bf16 %v27_v18, %v26_v17  ;;  %v28_v20 = vld [vmem:[%s269_s1 + $0x60] sm:$0xff]  ;;  %v29_v21 = vld [vmem:[%s269_s1 + $0x68] sm:$0xff]  ;;  %v30_v23 = vld [vmem:[%s269_s1 + $0x70] sm:$0xff] }
   0x6   :  { %v181_v22 = vpack.c.bf16 %v29_v21, %v28_v20  ;;  %v31_v24 = vld [vmem:[%s269_s1 + $0x78] sm:$0xff]  ;;  %v15_v26 = vld [vmem:[%s270_s0] sm:$0xff] }
   0x7   :  { %v184_v25 = vpack.c.bf16 %v31_v24, %v30_v23 }
   0x8   :  { %167 = vmatpush3.bf16.msra.mxu0 %v166_v7 }
   0x9   :  { %168 = vmatprep.subr.bf16.mxu0 %v189_v0 }
   0xc   :  { %170 = vmatpush3.bf16.msra.mxu0 %v169_v10 }
   0xd   :  { %171 = vmatprep.subr.bf16.mxu0 %v189_v0 }
  0x10   :  { %173 = vmatpush3.bf16.msra.mxu0 %v172_v13 }
  0x11   :  { %174 = vmatprep.subr.bf16.mxu0 %v189_v0 }
  0x14   :  { %176 = vmatpush3.bf16.msra.mxu0 %v175_v16 }
  0x15   :  { %177 = vmatprep.subr.bf16.mxu0 %v189_v0 }
  0x18   :  { %179 = vmatpush3.bf16.msra.mxu0 %v178_v19 }
  0x19   :  { %180 = vmatprep.subr.bf16.mxu0 %v189_v0 }
  0x1c   :  { %182 = vmatpush3.bf16.msra.mxu0 %v181_v22 }
  0x1d   :  { %183 = vmatprep.subr.bf16.mxu0 %v189_v0 }
  0x20   :  { %185 = vmatpush3.bf16.msra.mxu0 %v184_v25 }
  0x23   :  { %160 = vmatmul.mubr.f32.vlgmr.msra.gmra.mrb[0].mxu0 %v15_v26 }
  0xf6   :  { %v100_v28 = vpop.f32.mrb[0].mxu0 }
  0xf7   :  { %v101_v29 = vadd.f32 %v100_v28, %v33_v27  ;;  %v161_v30 = vpop.f32.mrb[1].mxu0 }
  0xf9   :  { %105 = vst.msk [vmem:[%s272_s3] sm:$0xff] %vm104_vm1, %v101_v29 }

</bundles_post_ra>
